<compile_context>
chip_gen: v7x
topology: tpu7x:2x2x1
jax: 0.10.0
libtpu: 0.0.40
codegen_flags: <defaults>
</compile_context>

<pallas_src>
import jax
import jax.numpy as jnp
from jax.experimental import pallas as pl
from jax.experimental.pallas import tpu as pltpu


def _round_up(n, m):
    return ((n + m - 1) // m) * m


def _cdiv(a, b):
    return -(-a // b)


def _mlp_kernel(x_ref, w1_ref, w2_ref, b2_ref, w3_ref, b3_ref, o_ref):
    mxu_dt = w2_ref.dtype

    # Layer 1: Linear + Tanh. x arrives already in the MXU dtype and carries a
    # constant-1 lane, so b1 (folded into w1) is added by the matmul itself.
    h = jnp.dot(x_ref[...], w1_ref[...], preferred_element_type=jnp.float32)
    h = jnp.tanh(h)

    # Layer 2 (hidden): Linear + Tanh (f32 accumulate, f32 bias add).
    h = jnp.dot(h.astype(mxu_dt), w2_ref[...], preferred_element_type=jnp.float32)
    h = jnp.tanh(h + b2_ref[0, :])

    # Final layer: Linear (weight/bias are zero at init; path preserved).
    out = jnp.dot(h.astype(mxu_dt), w3_ref[...], preferred_element_type=jnp.float32)
    o_ref[...] = (out + b3_ref[0, :]).astype(o_ref.dtype)


def prepare_params(params, *, use_bf16_matmul=True):
    """One-time padding / casting of the module parameters for the kernel.

    params: dict with w1 (n_in,H), b1 (1,H), w2 (H,H), b2 (1,H),
            w3 (H,n_out), b3 (1,n_out)   (weights stored (in_features, out_features))
    Returns a dict of kernel-ready arrays plus the logical n_in / n_out.
    """
    w1, b1 = params["w1"], params["b1"]
    w2, b2 = params["w2"], params["b2"]
    w3, b3 = params["w3"], params["b3"]

    n_in, hidden = w1.shape
    n_out = w3.shape[1]
    dt = jnp.bfloat16 if use_bf16_matmul else jnp.float32

    # +1 input lane carries the folded b1 row (the constant-1 column of x).
    in_pad = _round_up(n_in + 1, 128)
    out_pad = _round_up(n_out, 128)

    w1_p = jnp.zeros((in_pad, hidden), jnp.float32)
    w1_p = w1_p.at[:n_in, :].set(w1).at[n_in, :].set(b1[0])
    w1_p = w1_p.astype(dt)
    w2_p = w2.astype(dt)
    w3_p = jnp.zeros((hidden, out_pad), jnp.float32).at[:, :n_out].set(w3).astype(dt)
    b3_p = jnp.zeros((1, out_pad), jnp.float32).at[:, :n_out].set(b3)

    return {
        "w1": w1_p, "w2": w2_p, "b2": b2.astype(jnp.float32),
        "w3": w3_p, "b3": b3_p,
        "n_in": int(n_in), "n_out": int(n_out),
    }


def zero_init_feed_forward_nn_forward(x, prepared, *, block_batch=4096):
    """MLP forward pass as a batch-tiled Pallas kernel.

    x: (batch, n_in) float32
    prepared: output of prepare_params(...)
    returns: (batch, n_out) float32
    """
    w1, w2, b2 = prepared["w1"], prepared["w2"], prepared["b2"]
    w3, b3 = prepared["w3"], prepared["b3"]
    n_in, n_out = prepared["n_in"], prepared["n_out"]

    dt = w1.dtype
    in_pad, hidden = w1.shape
    out_pad = w3.shape[1]
    batch = x.shape[0]

    # bf16 packs 16 sublanes per vreg tile; f32 packs 8.
    sub = 16 if dt == jnp.bfloat16 else 8

    # Batch tile: capped by block_batch, then split evenly across grid steps so
    # multi-step grids (and v7x's two TensorCores) are load-balanced.
    tb_cap = min(_round_up(block_batch, sub), _round_up(batch, sub))
    n_steps = _cdiv(_round_up(batch, sub), tb_cap)
    tb = _round_up(_cdiv(batch, n_steps), sub)
    batch_p = tb * n_steps

    # Pad + cast the input in one pass, directly in the MXU dtype. Lane n_in is
    # the constant-1 column that folds b1 into the layer-1 matmul; padded rows
    # are all-zero (their results are sliced off below).
    x1 = jnp.concatenate([x.astype(dt), jnp.ones((batch, 1), dt)], axis=1)
    x_p = jnp.pad(x1, ((0, batch_p - batch), (0, in_pad - (n_in + 1))))

    resident = lambda shape: pl.BlockSpec(shape, lambda i: (0, 0))

    out_p = pl.pallas_call(
        _mlp_kernel,
        out_shape=jax.ShapeDtypeStruct((batch_p, out_pad), jnp.float32),
        grid=(n_steps,),
        in_specs=[
            pl.BlockSpec((tb, in_pad), lambda i: (i, 0)),   # x streamed over batch
            resident((in_pad, hidden)),                     # w1 (b1 folded in)
            resident((hidden, hidden)),                     # w2
            resident((1, hidden)),                          # b2
            resident((hidden, out_pad)),                    # w3
            resident((1, out_pad)),                         # b3
        ],
        out_specs=pl.BlockSpec((tb, out_pad), lambda i: (i, 0)),
        compiler_params=pltpu.CompilerParams(
            dimension_semantics=("parallel",),
            # Let XLA fuse the pad/cast producer of x into the kernel call so
            # the padded slab is not materialized as a separate HBM pass.
            allow_input_fusion=[True, False, False, False, False, False],
        ),
    )(x_p, w1, w2, b2, w3, b3)

    return out_p[:batch, :n_out]


def init_params(key, n_in=6, n_out=5, n_nodes_per_layer=64):
    """Mirror the PyTorch module's __init__:
    - hidden-layer Linear weights: U(-1/sqrt(fan_in), 1/sqrt(fan_in))
    - all biases: 0
    - final layer weight and bias: 0
    Weights are stored transposed: (in_features, out_features).
    """
    H = n_nodes_per_layer
    k1, k2 = jax.random.split(key, 2)

    bound1 = 1.0 / jnp.sqrt(jnp.float32(n_in))
    w1 = jax.random.uniform(k1, (n_in, H), jnp.float32, -bound1, bound1)
    b1 = jnp.zeros((1, H), jnp.float32)

    bound2 = 1.0 / jnp.sqrt(jnp.float32(H))
    w2 = jax.random.uniform(k2, (H, H), jnp.float32, -bound2, bound2)
    b2 = jnp.zeros((1, H), jnp.float32)

    w3 = jnp.zeros((H, n_out), jnp.float32)   # final layer weight := 0
    b3 = jnp.zeros((1, n_out), jnp.float32)   # final layer bias   := 0

    return {"w1": w1, "b1": b1, "w2": w2, "b2": b2, "w3": w3, "b3": b3}


def _reference_forward(x, params):
    h = jnp.tanh(x @ params["w1"] + params["b1"])
    h = jnp.tanh(h @ params["w2"] + params["b2"])
    return h @ params["w3"] + params["b3"]


if __name__ == "__main__":
    key = jax.random.PRNGKey(0)
    kx, kp, kx2, kw, kb = jax.random.split(key, 5)

    n_in, n_out, H = 6, 5, 64
    batch = 8

    x = jax.random.normal(kx, (batch, n_in), jnp.float32)
    params = init_params(kp, n_in=n_in, n_out=n_out, n_nodes_per_layer=H)

    # 1) Zero-init module (final layer weight/bias == 0): output must be 0.
    out0 = zero_init_feed_forward_nn_forward(x, prepare_params(params))
    out0 = jax.block_until_ready(out0)
    assert out0.shape == (batch, n_out), out0.shape
    assert jnp.allclose(out0, jnp.zeros((batch, n_out)), atol=1e-6), "zero-init output not zero"

    # 2) Non-trivial final layer (simulating trained params): check full path.
    trained = dict(params)
    trained["w3"] = 0.1 * jax.random.normal(kw, (H, n_out), jnp.float32)
    trained["b3"] = 0.1 * jax.random.normal(kb, (1, n_out), jnp.float32)
    ref = _reference_forward(x, trained)

    out_bf16 = zero_init_feed_forward_nn_forward(x, prepare_params(trained, use_bf16_matmul=True))
    out_bf16 = jax.block_until_ready(out_bf16)
    assert jnp.allclose(out_bf16, ref, atol=2e-2), "bf16-path mismatch vs reference"

    # 3) f32 path, multi-step grid with batch padding (20 rows -> 3 steps of 8).
    x2 = jax.random.normal(kx2, (20, n_in), jnp.float32)
    ref2 = _reference_forward(x2, trained)
    out_f32 = zero_init_feed_forward_nn_forward(
        x2, prepare_params(trained, use_bf16_matmul=False), block_batch=8)
    out_f32 = jax.block_until_ready(out_f32)
    assert out_f32.shape == (20, n_out), out_f32.shape
    assert jnp.allclose(out_f32, ref2, atol=1e-5), "f32-path mismatch vs reference"

    # 4) bf16 path, multi-step grid (16-row bf16 sublane-packed tiles).
    out_bf16_ms = zero_init_feed_forward_nn_forward(
        x2, prepare_params(trained, use_bf16_matmul=True), block_batch=16)
    out_bf16_ms = jax.block_until_ready(out_bf16_ms)
    assert jnp.allclose(out_bf16_ms, ref2, atol=2e-2), "bf16 multi-step mismatch vs reference"

    print("KERNEL_OK")
</pallas_src>

<mosaic_0001>
module attributes {stable_mosaic.version = 11 : i64} {
  func.func @_mlp_kernel(%arg0: i32, %arg1: memref<16x128xbf16, #tpu.memory_space<vmem>>, %arg2: memref<128x64xbf16, #tpu.memory_space<vmem>>, %arg3: memref<64x64xbf16, #tpu.memory_space<vmem>>, %arg4: memref<1x64xf32, #tpu.memory_space<vmem>>, %arg5: memref<64x128xbf16, #tpu.memory_space<vmem>>, %arg6: memref<1x128xf32, #tpu.memory_space<vmem>>, %arg7: memref<16x128xf32, #tpu.memory_space<vmem>>) attributes {dimension_semantics = [#tpu.dimension_semantics<parallel>], iteration_bounds = array<i64: 1>, scalar_prefetch = 0 : i64, scratch_operands = 0 : i64, tpu.core_type = #tpu.core_type<tc>, window_params = [{transform_indices = @transform_0, window_bounds = array<i64: 16, 128>}, {pipeline_mode = #tpu.pipeline_mode<synchronous>, transform_indices = @transform_1, window_bounds = array<i64: 128, 64>}, {pipeline_mode = #tpu.pipeline_mode<synchronous>, transform_indices = @transform_2, window_bounds = array<i64: 64, 64>}, {pipeline_mode = #tpu.pipeline_mode<synchronous>, transform_indices = @transform_3, window_bounds = array<i64: 1, 64>}, {pipeline_mode = #tpu.pipeline_mode<synchronous>, transform_indices = @transform_4, window_bounds = array<i64: 64, 128>}, {pipeline_mode = #tpu.pipeline_mode<synchronous>, transform_indices = @transform_5, window_bounds = array<i64: 1, 128>}, {transform_indices = @transform_6, window_bounds = array<i64: 16, 128>}]} {
    %c0 = arith.constant 0 : index
    %c0_0 = arith.constant 0 : index
    %0 = vector.load %arg1[%c0, %c0_0] : memref<16x128xbf16, #tpu.memory_space<vmem>>, vector<16x128xbf16>
    %c0_1 = arith.constant 0 : index
    %c0_2 = arith.constant 0 : index
    %1 = vector.load %arg2[%c0_1, %c0_2] : memref<128x64xbf16, #tpu.memory_space<vmem>>, vector<128x64xbf16>
    %cst = arith.constant dense<0.000000e+00> : vector<16x64xf32>
    %2 = tpu.matmul %0, %1, %cst {dimension_numbers = #tpu.dot_dimension_numbers<[1], [0], [0], [1], [0, 0, 1, 1], [], []>} : vector<16x128xbf16>, vector<128x64xbf16>, vector<16x64xf32> -> vector<16x64xf32>
    %3 = math.tanh %2 : vector<16x64xf32>
    %4 = arith.truncf %3 : vector<16x64xf32> to vector<16x64xbf16>
    %c0_3 = arith.constant 0 : index
    %c0_4 = arith.constant 0 : index
    %5 = vector.load %arg3[%c0_3, %c0_4] : memref<64x64xbf16, #tpu.memory_space<vmem>>, vector<64x64xbf16>
    %cst_5 = arith.constant dense<0.000000e+00> : vector<16x64xf32>
    %6 = tpu.matmul %4, %5, %cst_5 {dimension_numbers = #tpu.dot_dimension_numbers<[1], [0], [0], [1], [0, 0, 1, 1], [], []>} : vector<16x64xbf16>, vector<64x64xbf16>, vector<16x64xf32> -> vector<16x64xf32>
    %c0_6 = arith.constant 0 : index
    %c0_7 = arith.constant 0 : index
    %7 = vector.load %arg4[%c0_6, %c0_7] : memref<1x64xf32, #tpu.memory_space<vmem>>, vector<1x64xf32>
    %8 = vector.shape_cast %7 : vector<1x64xf32> to vector<64xf32>
    %9 = vector.shape_cast %8 : vector<64xf32> to vector<1x64xf32>
    %10 = vector.broadcast %9 : vector<1x64xf32> to vector<16x64xf32>
    %11 = arith.addf %6, %10 : vector<16x64xf32>
    %12 = math.tanh %11 : vector<16x64xf32>
    %13 = arith.truncf %12 : vector<16x64xf32> to vector<16x64xbf16>
    %c0_8 = arith.constant 0 : index
    %c0_9 = arith.constant 0 : index
    %14 = vector.load %arg5[%c0_8, %c0_9] : memref<64x128xbf16, #tpu.memory_space<vmem>>, vector<64x128xbf16>
    %cst_10 = arith.constant dense<0.000000e+00> : vector<16x128xf32>
    %15 = tpu.matmul %13, %14, %cst_10 {dimension_numbers = #tpu.dot_dimension_numbers<[1], [0], [0], [1], [0, 0, 1, 1], [], []>} : vector<16x64xbf16>, vector<64x128xbf16>, vector<16x128xf32> -> vector<16x128xf32>
    %c0_11 = arith.constant 0 : index
    %c0_12 = arith.constant 0 : index
    %16 = vector.load %arg6[%c0_11, %c0_12] : memref<1x128xf32, #tpu.memory_space<vmem>>, vector<1x128xf32>
    %17 = vector.shape_cast %16 : vector<1x128xf32> to vector<128xf32>
    %18 = vector.shape_cast %17 : vector<128xf32> to vector<1x128xf32>
    %19 = vector.broadcast %18 : vector<1x128xf32> to vector<16x128xf32>
    %20 = arith.addf %15, %19 : vector<16x128xf32>
    %c0_13 = arith.constant 0 : index
    %c0_14 = arith.constant 0 : index
    %21 = vector.load %arg7[%c0_13, %c0_14] : memref<16x128xf32, #tpu.memory_space<vmem>>, vector<16x128xf32>
    tpu.vector_store %arg7[%c0_13, %c0_14], %20 {strides = array<i32>} : memref<16x128xf32, #tpu.memory_space<vmem>>, vector<16x128xf32>,
    return
  }
  func.func @transform_0(%arg0: i32) -> (i32, i32) {
    %c0_i32 = arith.constant 0 : i32
    %c0_i32_0 = arith.constant 0 : i32
    return %arg0, %c0_i32 : i32, i32
  }
  func.func @transform_1(%arg0: i32) -> (i32, i32) {
    %c0_i32 = arith.constant 0 : i32
    %c0_i32_0 = arith.constant 0 : i32
    %c0_i32_1 = arith.constant 0 : i32
    return %c0_i32, %c0_i32_0 : i32, i32
  }
  func.func @transform_2(%arg0: i32) -> (i32, i32) {
    %c0_i32 = arith.constant 0 : i32
    %c0_i32_0 = arith.constant 0 : i32
    %c0_i32_1 = arith.constant 0 : i32
    return %c0_i32, %c0_i32_0 : i32, i32
  }
  func.func @transform_3(%arg0: i32) -> (i32, i32) {
    %c0_i32 = arith.constant 0 : i32
    %c0_i32_0 = arith.constant 0 : i32
    %c0_i32_1 = arith.constant 0 : i32
    return %c0_i32, %c0_i32_0 : i32, i32
  }
  func.func @transform_4(%arg0: i32) -> (i32, i32) {
    %c0_i32 = arith.constant 0 : i32
    %c0_i32_0 = arith.constant 0 : i32
    %c0_i32_1 = arith.constant 0 : i32
    return %c0_i32, %c0_i32_0 : i32, i32
  }
  func.func @transform_5(%arg0: i32) -> (i32, i32) {
    %c0_i32 = arith.constant 0 : i32
    %c0_i32_0 = arith.constant 0 : i32
    %c0_i32_1 = arith.constant 0 : i32
    return %c0_i32, %c0_i32_0 : i32, i32
  }
  func.func @transform_6(%arg0: i32) -> (i32, i32) {
    %c0_i32 = arith.constant 0 : i32
    %c0_i32_0 = arith.constant 0 : i32
    return %arg0, %c0_i32 : i32, i32
  }
}

</mosaic_0001>

<bundles_post_ra>
// kernel: tpu_custom_call.1
= control target key start
LH: loop header
LB: loop body
LE: loop exit
PB: predicated region body
PF: predicated region fallthrough
CT: control target
= control target key end

     0   :  { %v467_v1 = vmov 0.0   ;;  %vm468_vm0 = vmmov 0   ;;  %s600_s0 = inlined_call_operand.vmem [shape: bf16[16,128], index: 0, kind: input, shape index: {}]   ;;  %s601_s1 = inlined_call_operand.vmem [shape: bf16[128,64], index: 1, kind: input, shape index: {}]   ;;  %s602_s2 = inlined_call_operand.vmem [shape: bf16[64,64], index: 2, kind: input, shape index: {}]   ;;  %s603_s3 = inlined_call_operand.vmem [shape: f32[1,64], index: 3, kind: input, shape index: {}]   ;;  %s604_s4 = inlined_call_operand.vmem [shape: bf16[64,128], index: 4, kind: input, shape index: {}]   ;;  %s605_s5 = inlined_call_operand.vmem [shape: f32[1,128], index: 5, kind: input, shape index: {}]   ;;  %s606_s6 = inlined_call_operand.hbm [shape: f32[16,128], index: 6, kind: output, shape index: {}]  }
   0x1   :  { %v418_v0 = vld [vmem:[%s601_s1] sm:$0xff]   ;;  %369 = vmatprep.subr.bf16.mxu0 %v467_v1  ;;  %389 = vmatprep.subr.bf16.mxu1 %v467_v1  ;;  %v419_v2 = vld [vmem:[%s601_s1 + $0x8] sm:$0xff]   ;;  %v420_v3 = vld [vmem:[%s601_s1 + $0x10] sm:$0xff]  }
   0x2   :  { %370 = vmatpush3.bf16.msra.mxu0 %v418_v0  ;;  %385 = vmatprep.mubr.msk.bf16.mxu0 %vm468_vm0, %v467_v1  ;;  %v421_v4 = vld [vmem:[%s601_s1 + $0x18] sm:$0xff]   ;;  %v422_v5 = vld [vmem:[%s601_s1 + $0x20] sm:$0xff]  }
   0x3   :  { %371 = vmatprep.subr.bf16.mxu0 %v467_v1  ;;  %397 = vmatprep.mubr.msk.bf16.mxu1 %vm468_vm0, %v467_v1 }
   0x6   :  { %372 = vmatpush3.bf16.msra.mxu0 %v419_v2 }
   0x7   :  { %373 = vmatprep.subr.bf16.mxu0 %v467_v1 }
   0xa   :  { %374 = vmatpush3.bf16.msra.mxu0 %v420_v3 }
   0xb   :  { %375 = vmatprep.subr.bf16.mxu0 %v467_v1 }
   0xe   :  { %376 = vmatpush3.bf16.msra.mxu0 %v421_v4 }
   0xf   :  { %11 = vsyncpa [#allocation3], 0  ;;  %377 = vmatprep.subr.bf16.mxu0 %v467_v1  ;;  %v423_v6 = vld [vmem:[%s601_s1 + $0x28] sm:$0xff]   ;;  %v424_v7 = vld [vmem:[%s601_s1 + $0x30] sm:$0xff]   ;;  %vm180_vm1 = vcmask 523264   ;;  %s469_s7 = smov [#allocation2]  }
  0x10   :  { %v425_v8 = vld [vmem:[%s601_s1 + $0x38] sm:$0xff]   ;;  %v426_v9 = vld [vmem:[%s600_s0] sm:$0xff]   ;;  %v428_v11 = vld [vmem:[%s602_s2 + $0x8] sm:$0xff]   ;;  %s318_s8 = sshll.u32 %s469_s7, 4  ;;  %s319_s8 = int_to_ptr.vmem [resolvable:$true] %s318_s8 }
  0x11   :  { %v427_v10 = vld [vmem:[%s602_s2] sm:$0xff]   ;;  %v429_v12 = vld [vmem:[%s602_s2 + $0x10] sm:$0xff]   ;;  %v430_v13 = vld [vmem:[%s602_s2 + $0x18] sm:$0xff]   ;;  %p448_p1 = scmp.lt.s32.totalorder %s319_s8, %s319_s8 }
  0x12   :  { %378 = vmatpush3.bf16.msra.mxu0 %v422_v5  ;;  %390 = vmatpush3.bf16.msra.mxu1 %v427_v10  ;;  %v431_v21 = vld [vmem:[%s604_s4] sm:$0xff]   ;;  %v432_v22 = vld [vmem:[%s604_s4 + $0x8] sm:$0xff]   ;;  %v433_v23 = vld [vmem:[%s604_s4 + $0x10] sm:$0xff]  }
  0x13   :  { %379 = vmatprep.subr.bf16.mxu0 %v467_v1  ;;  %391 = vmatprep.subr.bf16.mxu1 %v467_v1  ;;  %v434_v24 = vld [vmem:[%s604_s4 + $0x18] sm:$0xff]   ;;  %v338_v25 = vld [vmem:[%s603_s3] ss:$0 sm:$0xff]  ;;  %s443_s3 = scalar_lea.vmem %s319_s8, 256 }
  0x14   :  { %v344_v35 = vld [vmem:[%s605_s5] ss:$0 sm:$0xff]  ;;  %p444_p0 = scmp.ne.s32.totalorder %s319_s8, %s443_s3  ;;  %p449_p2 = scmp.lt.s32.totalorder %s443_s3, %s443_s3 }
  0x16   :  { %380 = vmatpush3.bf16.msra.mxu0 %v423_v6  ;;  %392 = vmatpush3.bf16.msra.mxu1 %v428_v11  ;;  %p450_p3 = por %p449_p2, %p448_p1 }
  0x17   :  { %381 = vmatprep.subr.bf16.mxu0 %v467_v1  ;;  %393 = vmatprep.subr.bf16.mxu1 %v467_v1 }
  0x18   :  { %p451_p4 = pnand %p450_p3, %p444_p0 }
  0x1a   :  { %382 = vmatpush3.bf16.msra.mxu0 %v424_v7  ;;  %394 = vmatpush3.bf16.msra.mxu1 %v429_v12 }
  0x1b   :  { %383 = vmatprep.subr.bf16.mxu0 %v467_v1  ;;  %395 = vmatprep.subr.bf16.mxu1 %v467_v1 }
  0x1e   :  { %384 = vmatpush3.bf16.msra.mxu0 %v425_v8  ;;  %396 = vmatpush3.bf16.msra.mxu1 %v430_v13 }
  0x1f   :  { %401 = vmatprep.subr.bf16.mxu1 %v467_v1 }
  0x21   :  { %386 = vmatmul.mubr.bf16.vlgmr.msra.gmra.mrb[0].mxu0 %v426_v9 }
  0xf4   :  { %v131_v14 = vpop.f32.mrb[0].mxu0 }
  0xf5   :  { %v387_v15 = vpop.f32.mrb[1].mxu0  ;;  %435 = vtanh.f32 %v131_v14 }
  0xf6   :  { %v134_v16 = vpop.f32.mrb[2].mxu0 }
  0xf7   :  { %437 = vtanh.f32 %v134_v16  ;;  %v388_v17 = vpop.f32.mrb[3].mxu0 }
  0xff   :  { %v436_v18 = vpop.eup %435 }
 0x101   :  { %v438_v19 = vpop.eup %437 }
 0x102   :  { %v140_v20 = vpack.c.bf16 %v438_v19, %v436_v18 }
 0x104   :  { %398 = vmatmul.mubr.msk.bf16.vlgmr.msra.gmra.mrb[0].mxu1 %vm180_vm1, %v140_v20 }
 0x105   :  { %409 = vmatprep.mubr.msk.bf16.mxu1 %vm468_vm0, %v467_v1  ;;  %402 = vmatpush3.bf16.msra.mxu1 %v431_v21 }
 0x106   :  { %403 = vmatprep.subr.bf16.mxu1 %v467_v1 }
 0x109   :  { %404 = vmatpush3.bf16.msra.mxu1 %v432_v22 }
 0x10a   :  { %405 = vmatprep.subr.bf16.mxu1 %v467_v1 }
 0x10d   :  { %406 = vmatpush3.bf16.msra.mxu1 %v433_v23 }
 0x10e   :  { %407 = vmatprep.subr.bf16.mxu1 %v467_v1 }
 0x111   :  { %408 = vmatpush3.bf16.msra.mxu1 %v434_v24 }
 0x1d7   :  { %v218_v26 = vpop.f32.mrb[0].mxu1 }
 0x1d8   :  { %v219_v27 = vadd.f32 %v338_v25, %v218_v26  ;;  %v399_v28 = vpop.f32.mrb[1].mxu1 }
 0x1d9   :  { %v221_v29 = vpop.f32.mrb[2].mxu1 }
 0x1da   :  { %v222_v30 = vadd.f32 %v338_v25, %v221_v29  ;;  %v400_v31 = vpop.f32.mrb[3].mxu1  ;;  %439 = vtanh.f32 %v219_v27 }
 0x1dc   :  { %441 = vtanh.f32 %v222_v30 }
 0x1e4   :  { %v440_v32 = vpop.eup %439 }
 0x1e6   :  { %v442_v33 = vpop.eup %441 }
 0x1e7   :  { %v227_v34 = vpack.c.bf16 %v442_v33, %v440_v32 }
 0x1e9   :  { %410 = vmatmul.mubr.msk.bf16.vlgmr.msra.gmra.mrb[4].mxu1 %vm180_vm1, %v227_v34 }
 0x2bc   :  { %v304_v36 = vpop.f32.mrb[4].mxu1 }
 0x2bd   :  { %v305_v37 = vadd.f32 %v344_v35, %v304_v36  ;;  %v411_v38 = vpop.f32.mrb[5].mxu1 }
 0x2be   :  { %v307_v39 = vpop.f32.mrb[6].mxu1 }
 0x2bf   :  { %311 = vst [vmem:[#allocation2] sm:$0xff] %v305_v37  ;;  %v308_v40 = vadd.f32 %v344_v35, %v307_v39  ;;  %v412_v41 = vpop.f32.mrb[7].mxu1 }
 0x2c1   :  { %312 = vst [vmem:[#allocation2 + $0x8] sm:$0xff] %v308_v40 }
 0x2c2   :  { %454 = shalt.err (!%p451_p4)
}
 0x2c3   :  { %s455_s10 = scalar_lea.hbm %s606_s6, 256 }
 0x2c4   :  { %p456_p5 = scmp.ne.s32.totalorder %s606_s6, %s455_s10  ;;  %p459_p6 = scmp.lt.u32.totalorder %s455_s10, %s606_s6 }
 0x2c6   :  { %p461_p7 = pnand %p459_p6, %p456_p5 }
 0x2c8   :  { %464 = shalt.err (!%p461_p7)
}
 0x2c9   :  { %s470_s15 = smov 128   ;;  %s471_s16 = smov 8  }
 0x2ca   :  { %324 = dma.vmem_to_hbm [thread:$0]  %s319_s8, 256, %s606_s6, [#allocation3], %s470_s15, %s470_s15, %s471_s16  }
 0x2cb   :  { %465 = dma.done.wait [#allocation3], 256  }
 0x2cc   :  { %466 = vsyncadd [#allocation3], 4294967040 }
 0x2cd   :  { %328 = vsyncpa [#allocation3], 1 }

</bundles_post_ra>
